<compile_context>
chip_gen: v5e
topology: v5e:2x2
jax: 0.10.0
libtpu: 0.0.40
codegen_flags: <defaults>
</compile_context>

<pallas_src>
import jax
import jax.numpy as jnp
from jax.experimental import pallas as pl
from jax.experimental.pallas import tpu as pltpu

LANE = 128
SUBLANE = 8


def _round_up(x, m):
    return ((x + m - 1) // m) * m


def _pad_axis(a, axis, target):
    size = a.shape[axis]
    if size == target:
        return a
    pad = [(0, 0)] * a.ndim
    pad[axis] = (0, target - size)
    return jnp.pad(a, pad)


def _vmem_config():
    """Per-generation (vmem_limit_bytes, tiling_budget_bytes)."""
    kind = ""
    try:
        kind = jax.devices()[0].device_kind.lower()
    except Exception:
        pass
    if any(t in kind for t in ("v4", "v5", "v6")):
        # 128 MiB physical VMEM per core: use most of it, keep headroom for Mosaic scratch.
        limit = 112 * 1024 * 1024
    else:
        # v7x (64 MiB per-TC) or unknown generation: stay well below physical capacity.
        limit = 48 * 1024 * 1024
    budget = limit - 8 * 1024 * 1024
    return limit, budget


def combined_kernel(x_ref,
                    w_enc_ref, b_enc_ref,
                    w_dec_ref, b_dec_ref,
                    w_df_ref, b_df_ref,
                    w_cls_ref, b_cls_ref,
                    decoded_ref, out_ref):
    # x streamed as f32; cast to bf16 in-kernel (VPU) for full-rate MXU.
    x = x_ref[...].astype(jnp.bfloat16)  # (tile_b, Dp)

    # ---- autoencoder: Linear -> ReLU -> Linear ----
    enc = jnp.dot(x, w_enc_ref[...], preferred_element_type=jnp.float32)
    enc = jnp.maximum(enc + b_enc_ref[...], 0.0)
    enc_bf = enc.astype(jnp.bfloat16)

    dec = jnp.dot(enc_bf, w_dec_ref[...],
                  preferred_element_type=jnp.float32) + b_dec_ref[...]
    decoded_ref[...] = dec.astype(decoded_ref.dtype)

    # ---- featurizer fused with decoder (pre-composed weights) ----
    # feat = ReLU(dec @ w_feat + b_feat) = ReLU(enc @ (w_dec @ w_feat) + (b_dec @ w_feat + b_feat))
    feat = jnp.dot(enc_bf, w_df_ref[...], preferred_element_type=jnp.float32)
    feat = jnp.maximum(feat + b_df_ref[...], 0.0)

    # ---- classifier: Linear ----
    logits = jnp.dot(feat.astype(jnp.bfloat16), w_cls_ref[...],
                     preferred_element_type=jnp.float32) + b_cls_ref[...]
    out_ref[...] = logits.astype(out_ref.dtype)


def combined_model(x, params):
    """x: [B, D] float32. params: dict of f32 weights/biases ([in, out] layout).

    Returns (decoded [B, D] f32, output [B, C] f32)."""
    B, D = x.shape
    H = params["w_enc"].shape[1]
    F = params["w_feat"].shape[1]
    C = params["w_cls"].shape[1]

    Dp, Hp, Fp, Cp = (_round_up(s, LANE) for s in (D, H, F, C))
    vmem_limit, vmem_budget = _vmem_config()

    # Pre-compose decoder->featurizer in f32, then cast weights to bf16 once.
    w_df_f32 = params["w_dec"] @ params["w_feat"]                        # (H, F)
    b_df_f32 = params["b_dec"] @ params["w_feat"] + params["b_feat"]     # (1, F)

    # Zero-pad feature dims to lane width (inert through matmul/ReLU); x stays f32.
    xp = _pad_axis(x, 1, Dp)
    w_enc = _pad_axis(_pad_axis(params["w_enc"], 0, Dp), 1, Hp).astype(jnp.bfloat16)
    b_enc = _pad_axis(params["b_enc"], 1, Hp).astype(jnp.float32)
    w_dec = _pad_axis(_pad_axis(params["w_dec"], 0, Hp), 1, Dp).astype(jnp.bfloat16)
    b_dec = _pad_axis(params["b_dec"], 1, Dp).astype(jnp.float32)
    w_df = _pad_axis(_pad_axis(w_df_f32, 0, Hp), 1, Fp).astype(jnp.bfloat16)
    b_df = _pad_axis(b_df_f32, 1, Fp).astype(jnp.float32)
    w_cls = _pad_axis(_pad_axis(params["w_cls"], 0, Fp), 1, Cp).astype(jnp.bfloat16)
    b_cls = _pad_axis(params["b_cls"], 1, Cp).astype(jnp.float32)

    # --- VMEM accounting ---
    # Weight/bias blocks (conservatively assume Pallas double-buffers even constant blocks).
    weight_bytes = (2 * (Dp * Hp + Hp * Dp + Hp * Fp + Fp * Cp)   # bf16 weights
                    + 4 * (Hp + Dp + Fp + Cp))                    # f32 biases
    resident_bytes = 2 * weight_bytes
    # Streamed blocks (double-buffered): x f32 in, decoded f32 out, logits f32 out.
    stream_row = 2 * (4 * Dp) + 2 * (4 * Dp + 4 * Cp)
    # In-kernel intermediates (single-buffered): x bf16, enc f32+bf16, dec f32,
    # feat f32+bf16, logits f32.
    interm_row = 2 * Dp + 6 * Hp + 4 * Dp + 6 * Fp + 4 * Cp
    row_bytes = stream_row + interm_row

    cap = max(SUBLANE, (vmem_budget - resident_bytes) // max(row_bytes, 1))
    tile_b = min(B, int(cap))
    if tile_b >= 16:
        tile_b = (tile_b // 16) * 16      # bf16: 16 rows per vreg (sublane packing)
    elif tile_b >= SUBLANE:
        tile_b = (tile_b // SUBLANE) * SUBLANE
    tile_b = max(1, tile_b)

    grid = (pl.cdiv(B, tile_b),)

    def row_spec(shape):      # streamed per grid step
        return pl.BlockSpec(shape, lambda i: (i, 0))

    def fixed_spec(shape):    # VMEM-resident across all grid steps
        return pl.BlockSpec(shape, lambda i: (0, 0))

    in_specs = [
        row_spec((tile_b, Dp)),
        fixed_spec((Dp, Hp)), fixed_spec((1, Hp)),
        fixed_spec((Hp, Dp)), fixed_spec((1, Dp)),
        fixed_spec((Hp, Fp)), fixed_spec((1, Fp)),
        fixed_spec((Fp, Cp)), fixed_spec((1, Cp)),
    ]
    out_specs = (
        row_spec((tile_b, Dp)),
        row_spec((tile_b, Cp)),
    )

    flops = 2 * B * (Dp * Hp + Hp * Dp + Hp * Fp + Fp * Cp)
    bytes_accessed = int(B * Dp * 4 + weight_bytes + B * Dp * 4 + B * Cp * 4)
    cost = pl.CostEstimate(flops=flops, transcendentals=0, bytes_accessed=bytes_accessed)

    decoded_p, out_p = pl.pallas_call(
        combined_kernel,
        grid=grid,
        in_specs=in_specs,
        out_specs=out_specs,
        out_shape=(
            jax.ShapeDtypeStruct((B, Dp), jnp.float32),
            jax.ShapeDtypeStruct((B, Cp), jnp.float32),
        ),
        compiler_params=pltpu.CompilerParams(
            dimension_semantics=("parallel",),
            vmem_limit_bytes=vmem_limit),
        cost_estimate=cost,
    )(xp, w_enc, b_enc, w_dec, b_dec, w_df, b_df, w_cls, b_cls)

    # Slice off zero-padded lanes only when padding was actually applied (when D is a
    # multiple of 128, the dominant decoded tensor needs no extra HBM read+write pass).
    decoded = decoded_p if D == Dp else decoded_p[:, :D]
    output = out_p if C == Cp else out_p[:, :C]
    return decoded, output


def init_params(key, D, H, F, C):
    ks = jax.random.split(key, 8)
    scale = lambda fan_in: 1.0 / jnp.sqrt(fan_in)
    return {
        "w_enc":  jax.random.normal(ks[0], (D, H), jnp.float32) * scale(D),
        "b_enc":  jax.random.normal(ks[1], (1, H), jnp.float32) * 0.01,
        "w_dec":  jax.random.normal(ks[2], (H, D), jnp.float32) * scale(H),
        "b_dec":  jax.random.normal(ks[3], (1, D), jnp.float32) * 0.01,
        "w_feat": jax.random.normal(ks[4], (D, F), jnp.float32) * scale(D),
        "b_feat": jax.random.normal(ks[5], (1, F), jnp.float32) * 0.01,
        "w_cls":  jax.random.normal(ks[6], (F, C), jnp.float32) * scale(F),
        "b_cls":  jax.random.normal(ks[7], (1, C), jnp.float32) * 0.01,
    }


def reference(x, p):
    enc = jnp.maximum(x @ p["w_enc"] + p["b_enc"], 0.0)
    dec = enc @ p["w_dec"] + p["b_dec"]
    feat = jnp.maximum(dec @ p["w_feat"] + p["b_feat"], 0.0)
    out = feat @ p["w_cls"] + p["b_cls"]
    return dec, out


if __name__ == "__main__":
    B, D, H, F, C = 8, 128, 32, 64, 16
    key = jax.random.PRNGKey(0)
    kx, kp = jax.random.split(key)
    x = jax.random.normal(kx, (B, D), jnp.float32)
    params = init_params(kp, D, H, F, C)

    decoded, output = combined_model(x, params)
    jax.block_until_ready((decoded, output))

    dec_ref, out_ref = reference(x, params)
    assert decoded.shape == (B, D) and output.shape == (B, C)
    # bf16 MXU inputs with f32 accumulation -> loosen tolerance vs the f32 reference.
    assert jnp.allclose(decoded, dec_ref, atol=5e-2, rtol=5e-2)
    assert jnp.allclose(output, out_ref, atol=5e-2, rtol=5e-2)
    print("KERNEL_OK")
</pallas_src>

<mosaic_0001>
module attributes {stable_mosaic.version = 11 : i64} {
  func.func @combined_kernel(%arg0: i32, %arg1: memref<8x128xf32, #tpu.memory_space<vmem>>, %arg2: memref<128x128xbf16, #tpu.memory_space<vmem>>, %arg3: memref<1x128xf32, #tpu.memory_space<vmem>>, %arg4: memref<128x128xbf16, #tpu.memory_space<vmem>>, %arg5: memref<1x128xf32, #tpu.memory_space<vmem>>, %arg6: memref<128x128xbf16, #tpu.memory_space<vmem>>, %arg7: memref<1x128xf32, #tpu.memory_space<vmem>>, %arg8: memref<128x128xbf16, #tpu.memory_space<vmem>>, %arg9: memref<1x128xf32, #tpu.memory_space<vmem>>, %arg10: memref<8x128xf32, #tpu.memory_space<vmem>>, %arg11: memref<8x128xf32, #tpu.memory_space<vmem>>) attributes {dimension_semantics = [#tpu.dimension_semantics<parallel>], iteration_bounds = array<i64: 1>, scalar_prefetch = 0 : i64, scratch_operands = 0 : i64, tpu.core_type = #tpu.core_type<tc>, window_params = [{transform_indices = @transform_0, window_bounds = array<i64: 8, 128>}, {pipeline_mode = #tpu.pipeline_mode<synchronous>, transform_indices = @transform_1, window_bounds = array<i64: 128, 128>}, {pipeline_mode = #tpu.pipeline_mode<synchronous>, transform_indices = @transform_2, window_bounds = array<i64: 1, 128>}, {pipeline_mode = #tpu.pipeline_mode<synchronous>, transform_indices = @transform_3, window_bounds = array<i64: 128, 128>}, {pipeline_mode = #tpu.pipeline_mode<synchronous>, transform_indices = @transform_4, window_bounds = array<i64: 1, 128>}, {pipeline_mode = #tpu.pipeline_mode<synchronous>, transform_indices = @transform_5, window_bounds = array<i64: 128, 128>}, {pipeline_mode = #tpu.pipeline_mode<synchronous>, transform_indices = @transform_6, window_bounds = array<i64: 1, 128>}, {pipeline_mode = #tpu.pipeline_mode<synchronous>, transform_indices = @transform_7, window_bounds = array<i64: 128, 128>}, {pipeline_mode = #tpu.pipeline_mode<synchronous>, transform_indices = @transform_8, window_bounds = array<i64: 1, 128>}, {transform_indices = @transform_9, window_bounds = array<i64: 8, 128>}, {transform_indices = @transform_10, window_bounds = array<i64: 8, 128>}]} {
    %c0 = arith.constant 0 : index
    %c0_0 = arith.constant 0 : index
    %0 = vector.load %arg1[%c0, %c0_0] : memref<8x128xf32, #tpu.memory_space<vmem>>, vector<8x128xf32>
    %1 = arith.truncf %0 : vector<8x128xf32> to vector<8x128xbf16>
    %c0_1 = arith.constant 0 : index
    %c0_2 = arith.constant 0 : index
    %2 = vector.load %arg2[%c0_1, %c0_2] : memref<128x128xbf16, #tpu.memory_space<vmem>>, vector<128x128xbf16>
    %cst = arith.constant dense<0.000000e+00> : vector<8x128xf32>
    %3 = tpu.matmul %1, %2, %cst {dimension_numbers = #tpu.dot_dimension_numbers<[1], [0], [0], [1], [0, 0, 1, 1], [], []>} : vector<8x128xbf16>, vector<128x128xbf16>, vector<8x128xf32> -> vector<8x128xf32>
    %c0_3 = arith.constant 0 : index
    %c0_4 = arith.constant 0 : index
    %4 = vector.load %arg3[%c0_3, %c0_4] : memref<1x128xf32, #tpu.memory_space<vmem>>, vector<1x128xf32>
    %5 = vector.broadcast %4 : vector<1x128xf32> to vector<8x128xf32>
    %6 = arith.addf %3, %5 : vector<8x128xf32>
    %cst_5 = arith.constant 0.000000e+00 : f32
    %7 = vector.broadcast %cst_5 : f32 to vector<8x128xf32>
    %8 = arith.maximumf %6, %7 : vector<8x128xf32>
    %9 = arith.truncf %8 : vector<8x128xf32> to vector<8x128xbf16>
    %c0_6 = arith.constant 0 : index
    %c0_7 = arith.constant 0 : index
    %10 = vector.load %arg4[%c0_6, %c0_7] : memref<128x128xbf16, #tpu.memory_space<vmem>>, vector<128x128xbf16>
    %cst_8 = arith.constant dense<0.000000e+00> : vector<8x128xf32>
    %11 = tpu.matmul %9, %10, %cst_8 {dimension_numbers = #tpu.dot_dimension_numbers<[1], [0], [0], [1], [0, 0, 1, 1], [], []>} : vector<8x128xbf16>, vector<128x128xbf16>, vector<8x128xf32> -> vector<8x128xf32>
    %c0_9 = arith.constant 0 : index
    %c0_10 = arith.constant 0 : index
    %12 = vector.load %arg5[%c0_9, %c0_10] : memref<1x128xf32, #tpu.memory_space<vmem>>, vector<1x128xf32>
    %13 = vector.broadcast %12 : vector<1x128xf32> to vector<8x128xf32>
    %14 = arith.addf %11, %13 : vector<8x128xf32>
    %c0_11 = arith.constant 0 : index
    %c0_12 = arith.constant 0 : index
    %15 = vector.load %arg10[%c0_11, %c0_12] : memref<8x128xf32, #tpu.memory_space<vmem>>, vector<8x128xf32>
    tpu.vector_store %arg10[%c0_11, %c0_12], %14 {strides = array<i32>} : memref<8x128xf32, #tpu.memory_space<vmem>>, vector<8x128xf32>,
    %c0_13 = arith.constant 0 : index
    %c0_14 = arith.constant 0 : index
    %16 = vector.load %arg6[%c0_13, %c0_14] : memref<128x128xbf16, #tpu.memory_space<vmem>>, vector<128x128xbf16>
    %cst_15 = arith.constant dense<0.000000e+00> : vector<8x128xf32>
    %17 = tpu.matmul %9, %16, %cst_15 {dimension_numbers = #tpu.dot_dimension_numbers<[1], [0], [0], [1], [0, 0, 1, 1], [], []>} : vector<8x128xbf16>, vector<128x128xbf16>, vector<8x128xf32> -> vector<8x128xf32>
    %c0_16 = arith.constant 0 : index
    %c0_17 = arith.constant 0 : index
    %18 = vector.load %arg7[%c0_16, %c0_17] : memref<1x128xf32, #tpu.memory_space<vmem>>, vector<1x128xf32>
    %19 = vector.broadcast %18 : vector<1x128xf32> to vector<8x128xf32>
    %20 = arith.addf %17, %19 : vector<8x128xf32>
    %cst_18 = arith.constant 0.000000e+00 : f32
    %21 = vector.broadcast %cst_18 : f32 to vector<8x128xf32>
    %22 = arith.maximumf %20, %21 : vector<8x128xf32>
    %23 = arith.truncf %22 : vector<8x128xf32> to vector<8x128xbf16>
    %c0_19 = arith.constant 0 : index
    %c0_20 = arith.constant 0 : index
    %24 = vector.load %arg8[%c0_19, %c0_20] : memref<128x128xbf16, #tpu.memory_space<vmem>>, vector<128x128xbf16>
    %cst_21 = arith.constant dense<0.000000e+00> : vector<8x128xf32>
    %25 = tpu.matmul %23, %24, %cst_21 {dimension_numbers = #tpu.dot_dimension_numbers<[1], [0], [0], [1], [0, 0, 1, 1], [], []>} : vector<8x128xbf16>, vector<128x128xbf16>, vector<8x128xf32> -> vector<8x128xf32>
    %c0_22 = arith.constant 0 : index
    %c0_23 = arith.constant 0 : index
    %26 = vector.load %arg9[%c0_22, %c0_23] : memref<1x128xf32, #tpu.memory_space<vmem>>, vector<1x128xf32>
    %27 = vector.broadcast %26 : vector<1x128xf32> to vector<8x128xf32>
    %28 = arith.addf %25, %27 : vector<8x128xf32>
    %c0_24 = arith.constant 0 : index
    %c0_25 = arith.constant 0 : index
    %29 = vector.load %arg11[%c0_24, %c0_25] : memref<8x128xf32, #tpu.memory_space<vmem>>, vector<8x128xf32>
    tpu.vector_store %arg11[%c0_24, %c0_25], %28 {strides = array<i32>} : memref<8x128xf32, #tpu.memory_space<vmem>>, vector<8x128xf32>,
    return
  }
  func.func @transform_0(%arg0: i32) -> (i32, i32) {
    %c0_i32 = arith.constant 0 : i32
    %c0_i32_0 = arith.constant 0 : i32
    return %arg0, %c0_i32 : i32, i32
  }
  func.func @transform_1(%arg0: i32) -> (i32, i32) {
    %c0_i32 = arith.constant 0 : i32
    %c0_i32_0 = arith.constant 0 : i32
    %c0_i32_1 = arith.constant 0 : i32
    return %c0_i32, %c0_i32_0 : i32, i32
  }
  func.func @transform_2(%arg0: i32) -> (i32, i32) {
    %c0_i32 = arith.constant 0 : i32
    %c0_i32_0 = arith.constant 0 : i32
    %c0_i32_1 = arith.constant 0 : i32
    return %c0_i32, %c0_i32_0 : i32, i32
  }
  func.func @transform_3(%arg0: i32) -> (i32, i32) {
    %c0_i32 = arith.constant 0 : i32
    %c0_i32_0 = arith.constant 0 : i32
    %c0_i32_1 = arith.constant 0 : i32
    return %c0_i32, %c0_i32_0 : i32, i32
  }
  func.func @transform_4(%arg0: i32) -> (i32, i32) {
    %c0_i32 = arith.constant 0 : i32
    %c0_i32_0 = arith.constant 0 : i32
    %c0_i32_1 = arith.constant 0 : i32
    return %c0_i32, %c0_i32_0 : i32, i32
  }
  func.func @transform_5(%arg0: i32) -> (i32, i32) {
    %c0_i32 = arith.constant 0 : i32
    %c0_i32_0 = arith.constant 0 : i32
    %c0_i32_1 = arith.constant 0 : i32
    return %c0_i32, %c0_i32_0 : i32, i32
  }
  func.func @transform_6(%arg0: i32) -> (i32, i32) {
    %c0_i32 = arith.constant 0 : i32
    %c0_i32_0 = arith.constant 0 : i32
    %c0_i32_1 = arith.constant 0 : i32
    return %c0_i32, %c0_i32_0 : i32, i32
  }
  func.func @transform_7(%arg0: i32) -> (i32, i32) {
    %c0_i32 = arith.constant 0 : i32
    %c0_i32_0 = arith.constant 0 : i32
    %c0_i32_1 = arith.constant 0 : i32
    return %c0_i32, %c0_i32_0 : i32, i32
  }
  func.func @transform_8(%arg0: i32) -> (i32, i32) {
    %c0_i32 = arith.constant 0 : i32
    %c0_i32_0 = arith.constant 0 : i32
    %c0_i32_1 = arith.constant 0 : i32
    return %c0_i32, %c0_i32_0 : i32, i32
  }
  func.func @transform_9(%arg0: i32) -> (i32, i32) {
    %c0_i32 = arith.constant 0 : i32
    %c0_i32_0 = arith.constant 0 : i32
    return %arg0, %c0_i32 : i32, i32
  }
  func.func @transform_10(%arg0: i32) -> (i32, i32) {
    %c0_i32 = arith.constant 0 : i32
    %c0_i32_0 = arith.constant 0 : i32
    return %arg0, %c0_i32 : i32, i32
  }
}

</mosaic_0001>

<bundles_post_ra>
// kernel: tpu_custom_call.1
= control target key start
LH: loop header
LB: loop body
LE: loop exit
PB: predicated region body
PF: predicated region fallthrough
CT: control target
= control target key end

     0   :  { %16 = vsyncpa [#allocation3], 0  ;;  %s927_s0 = inlined_call_operand.hbm [shape: f32[8,128], index: 0, kind: input, shape index: {}]   ;;  %s928_s1 = inlined_call_operand.hbm [shape: bf16[128,128], index: 1, kind: input, shape index: {}]   ;;  %s929_s2 = inlined_call_operand.vmem [shape: f32[1,128], index: 2, kind: input, shape index: {}]   ;;  %s930_s3 = inlined_call_operand.hbm [shape: bf16[128,128], index: 3, kind: input, shape index: {}]   ;;  %s931_s4 = inlined_call_operand.vmem [shape: f32[1,128], index: 4, kind: input, shape index: {}]   ;;  %s932_s5 = inlined_call_operand.hbm [shape: bf16[128,128], index: 5, kind: input, shape index: {}]   ;;  %s933_s6 = inlined_call_operand.vmem [shape: f32[1,128], index: 6, kind: input, shape index: {}]   ;;  %s934_s7 = inlined_call_operand.hbm [shape: bf16[128,128], index: 7, kind: input, shape index: {}]   ;;  %s935_s8 = inlined_call_operand.vmem [shape: f32[1,128], index: 8, kind: input, shape index: {}]   ;;  %s936_s9 = inlined_call_operand.hbm [shape: f32[8,128], index: 9, kind: output, shape index: {0}]   ;;  %s937_s10 = inlined_call_operand.hbm [shape: f32[8,128], index: 10, kind: output, shape index: {1}]  }
   0x1   :  { %17 = vsyncpa [#allocation6], 0 }
   0x2   :  { %18 = vsyncpa [#allocation9], 0 }
   0x3   :  { %19 = vsyncpa [#allocation4], 0  ;;  %s36_s15 = sshll.u32 %s928_s1, 4  ;;  %s37_s15 = int_to_ptr.hbm [resolvable:$true] %s36_s15 }
   0x4   :  { %20 = vsyncpa [#allocation13], 0  ;;  %s830_s16 = smov [#allocation5]   ;;  %s66_s20 = sshll.u32 %s932_s5, 4  ;;  %s67_s20 = int_to_ptr.hbm [resolvable:$true] %s66_s20 }
   0x5   :  { %s38_s17 = sshll.u32 %s830_s16, 4  ;;  %s831_s21 = smov 64   ;;  %s39_s17 = int_to_ptr.vmem [resolvable:$true] %s38_s17 }
   0x6   :  { %s832_s22 = smov 4   ;;  %s833_s23 = smov [#allocation8]  }
   0x7   :  { %44 = dma.hbm_to_vmem [thread:$0]  %s37_s15, 1024, %s39_s17, [#allocation6], %s831_s21, %s831_s21, %s832_s22  }
   0x8   :  { %s68_s24 = sshll.u32 %s833_s23, 4  ;;  %s26_s27 = sshll.u32 %s927_s0, 4  ;;  %s69_s24 = int_to_ptr.vmem [resolvable:$true] %s68_s24  ;;  %s27_s27 = int_to_ptr.hbm [resolvable:$true] %s26_s27 }
   0x9   :  { %74 = dma.hbm_to_vmem [thread:$0]  %s67_s20, 1024, %s69_s24, [#allocation9], %s831_s21, %s831_s21, %s832_s22  }
   0xa   :  { %s51_s29 = sshll.u32 %s930_s3, 4  ;;  %s834_s30 = smov [#allocation2]   ;;  %s52_s29 = int_to_ptr.hbm [resolvable:$true] %s51_s29 }
   0xb   :  { %s28_s11 = sshll.u32 %s834_s30, 4  ;;  %s835_s5 = smov [#allocation7]   ;;  %s29_s11 = int_to_ptr.vmem [resolvable:$true] %s28_s11 }
   0xc   :  { %31 = dma.hbm_to_vmem [thread:$0]  %s27_s27, 128, %s29_s11, [#allocation3]  }
   0xd   :  { %s53_s12 = sshll.u32 %s835_s5, 4  ;;  %s81_s15 = sshll.u32 %s934_s7, 4  ;;  %s54_s12 = int_to_ptr.vmem [resolvable:$true] %s53_s12  ;;  %s82_s15 = int_to_ptr.hbm [resolvable:$true] %s81_s15 }
   0xe   :  { %59 = dma.hbm_to_vmem [thread:$0]  %s52_s29, 1024, %s54_s12, [#allocation6], %s831_s21, %s831_s21, %s832_s22  }
   0xf   :  { %s836_s0 = smov [#allocation10]  }
  0x10   :  { %s83_s16 = sshll.u32 %s836_s0, 4  ;;  %s84_s16 = int_to_ptr.vmem [resolvable:$true] %s83_s16 }
  0x11   :  { %89 = dma.hbm_to_vmem [thread:$0]  %s82_s15, 1024, %s84_s16, [#allocation9], %s831_s21, %s831_s21, %s832_s22  }
  0x12   :  { %820 = dma.done.wait [#allocation3], 128  }
  0x13   :  { %821 = vsyncadd [#allocation3], 4294967168 }
  0x14   :  { %822 = dma.done.wait [#allocation6], 2048  }
  0x15   :  { %823 = vsyncadd [#allocation6], 4294965248 }
  0x16   :  { %824 = dma.done.wait [#allocation9], 2048  }
  0x17   :  { %825 = vsyncadd [#allocation9], 4294965248  ;;  %v614_v0 = vld [vmem:[#allocation5 + $0x38] sm:$0xff]  ;;  %v613_v1 = vld [vmem:[#allocation5 + $0x30] sm:$0xff]  ;;  %s837_s20 = smov [#allocation11]   ;;  %s462_s28 = sshll.u32 %s937_s10, 4  ;;  %s463_s28 = int_to_ptr.hbm [resolvable:$true] %s462_s28 }
  0x18   :  { %182 = vmatpush.bf16.msra.mxu0 %v614_v0  ;;  %v622_v2 = vld [vmem:[#allocation7 + $0x38] sm:$0xff]  ;;  %v621_v4 = vld [vmem:[#allocation7 + $0x30] sm:$0xff]  ;;  %v612_v6 = vld [vmem:[#allocation5 + $0x28] sm:$0xff]  ;;  %s449_s21 = sshll.u32 %s837_s20, 4  ;;  %s450_s21 = int_to_ptr.vmem [resolvable:$true] %s449_s21 }
  0x19   :  { %v630_v3 = vld [vmem:[#allocation8 + $0x38] sm:$0xff]  ;;  %265 = vmatpush.bf16.msra.mxu1 %v622_v2  ;;  %v629_v5 = vld [vmem:[#allocation8 + $0x30] sm:$0xff]  ;;  %v620_v7 = vld [vmem:[#allocation7 + $0x28] sm:$0xff] }
  0x1a   :  { %347 = vmatpush.bf16.msra.mxu2 %v630_v3  ;;  %v628_v8 = vld [vmem:[#allocation8 + $0x28] sm:$0xff]  ;;  %v611_v9 = vld [vmem:[#allocation5 + $0x20] sm:$0xff]  ;;  %v610_v12 = vld [vmem:[#allocation5 + $0x18] sm:$0xff] }
  0x1b   :  { %v619_v10 = vld [vmem:[#allocation7 + $0x20] sm:$0xff]  ;;  %v618_v13 = vld [vmem:[#allocation7 + $0x18] sm:$0xff]  ;;  %v609_v15 = vld [vmem:[#allocation5 + $0x10] sm:$0xff] }
  0x1c   :  { %183 = vmatpush.bf16.msra.mxu0 %v613_v1  ;;  %v627_v11 = vld [vmem:[#allocation8 + $0x20] sm:$0xff]  ;;  %v626_v14 = vld [vmem:[#allocation8 + $0x18] sm:$0xff]  ;;  %v617_v16 = vld [vmem:[#allocation7 + $0x10] sm:$0xff] }
  0x1d   :  { %266 = vmatpush.bf16.msra.mxu1 %v621_v4  ;;  %v625_v17 = vld [vmem:[#allocation8 + $0x10] sm:$0xff]  ;;  %v608_v18 = vld [vmem:[#allocation5 + $0x8] sm:$0xff]  ;;  %v607_v19 = vld [vmem:[#allocation5] sm:$0xff] }
  0x1e   :  { %348 = vmatpush.bf16.msra.mxu2 %v629_v5  ;;  %v112_v20 = vld [vmem:[#allocation2] sm:$0xff]  ;;  %v616_v22 = vld [vmem:[#allocation7 + $0x8] sm:$0xff]  ;;  %v615_v24 = vld [vmem:[#allocation7] sm:$0xff] }
  0x1f   :  { %v113_v21 = vpack.c.bf16 %v112_v20, %v112_v20  ;;  %v624_v23 = vld [vmem:[#allocation8 + $0x8] sm:$0xff]  ;;  %v623_v25 = vld [vmem:[#allocation8] sm:$0xff]  ;;  %v638_v26 = vld [vmem:[#allocation10 + $0x38] sm:$0xff] }
  0x20   :  { %184 = vmatpush.bf16.msra.mxu0 %v612_v6  ;;  %430 = vmatpush.bf16.msra.mxu3 %v638_v26  ;;  %v637_v27 = vld [vmem:[#allocation10 + $0x30] sm:$0xff]  ;;  %v636_v28 = vld [vmem:[#allocation10 + $0x28] sm:$0xff]  ;;  %v635_v29 = vld [vmem:[#allocation10 + $0x20] sm:$0xff] }
  0x21   :  { %267 = vmatpush.bf16.msra.mxu1 %v620_v7  ;;  %v634_v30 = vld [vmem:[#allocation10 + $0x18] sm:$0xff]  ;;  %v633_v37 = vld [vmem:[#allocation10 + $0x10] sm:$0xff]  ;;  %v632_v38 = vld [vmem:[#allocation10 + $0x8] sm:$0xff] }
  0x22   :  { %349 = vmatpush.bf16.msra.mxu2 %v628_v8  ;;  %v648_v31 = vld [vmem:[%s929_s2] ss:$0 sm:$0xff]  ;;  %v631_v39 = vld [vmem:[#allocation10] sm:$0xff] }
  0x23   :  { %v649_v40 = vld [vmem:[%s931_s4] ss:$0 sm:$0xff]  ;;  %s451_s4 = sshll.u32 %s936_s9, 4  ;;  %s452_s4 = int_to_ptr.hbm [resolvable:$true] %s451_s4 }
  0x24   :  { %185 = vmatpush.bf16.msra.mxu0 %v611_v9  ;;  %431 = vmatpush.bf16.msra.mxu3 %v637_v27  ;;  %v650_v43 = vld [vmem:[%s933_s6] ss:$0 sm:$0xff]  ;;  %s838_s6 = smov [#allocation12]  }
  0x25   :  { %268 = vmatpush.bf16.msra.mxu1 %v619_v10  ;;  %v651_v50 = vld [vmem:[%s935_s8] ss:$0 sm:$0xff]  ;;  %s460_s26 = sshll.u32 %s838_s6, 4  ;;  %s461_s26 = int_to_ptr.vmem [resolvable:$true] %s460_s26 }
  0x26   :  { %350 = vmatpush.bf16.msra.mxu2 %v627_v11 }
  0x28   :  { %186 = vmatpush.bf16.msra.mxu0 %v610_v12  ;;  %432 = vmatpush.bf16.msra.mxu3 %v636_v28 }
  0x29   :  { %269 = vmatpush.bf16.msra.mxu1 %v618_v13 }
  0x2a   :  { %351 = vmatpush.bf16.msra.mxu2 %v626_v14 }
  0x2c   :  { %187 = vmatpush.bf16.msra.mxu0 %v609_v15  ;;  %433 = vmatpush.bf16.msra.mxu3 %v635_v29 }
  0x2d   :  { %270 = vmatpush.bf16.msra.mxu1 %v617_v16 }
  0x2e   :  { %352 = vmatpush.bf16.msra.mxu2 %v625_v17 }
  0x30   :  { %188 = vmatpush.bf16.msra.mxu0 %v608_v18  ;;  %434 = vmatpush.bf16.msra.mxu3 %v634_v30 }
  0x31   :  { %271 = vmatpush.bf16.msra.mxu1 %v616_v22 }
  0x32   :  { %353 = vmatpush.bf16.msra.mxu2 %v624_v23 }
  0x34   :  { %189 = vmatpush.bf16.msra.mxu0 %v607_v19  ;;  %435 = vmatpush.bf16.msra.mxu3 %v633_v37 }
  0x35   :  { %272 = vmatpush.bf16.msra.mxu1 %v615_v24 }
  0x36   :  { %354 = vmatpush.bf16.msra.mxu2 %v623_v25 }
  0x37   :  { %190 = vmatmul.bf16.vlgmr.msra.gmra.mxu0 %v113_v21 }
  0x38   :  { %436 = vmatpush.bf16.msra.mxu3 %v632_v38 }
  0x3c   :  { %437 = vmatpush.bf16.msra.mxu3 %v631_v39 }
  0xb4   :  { %v191_v32 = vpop.f32.mrf.mxu0 }
  0xb5   :  { %v192_v33 = vadd.f32 %v648_v31, %v191_v32 }
  0xb7   :  { %v195_v34 = vmax.f32 %v192_v33, 0.0 }
  0xb9   :  { %v196_v35 = vpack.c.bf16 %v195_v34, %v195_v34 }
  0xbb   :  { %273 = vmatmul.bf16.vlgmr.msra.gmra.mxu1 %v196_v35  ;;  %355 = vmatmul.bf16.vlgmr.msra.gmra.mxu2 %v196_v35 }
  0xbc   :  { %v193_v36 = vpop.f32.mrf.mxu0 }
 0x138   :  { %v274_v41 = vpop.f32.mrf.mxu1 }
 0x139   :  { %v275_v42 = vadd.f32 %v649_v40, %v274_v41 }
 0x13b   :  { %278 = vst [vmem:[#allocation11] sm:$0xff] %v275_v42 }
 0x13c   :  { %454 = dma.vmem_to_hbm [thread:$0]  %s450_s21, 128, %s452_s4, [#allocation4]  }
 0x13e   :  { %v356_v44 = vpop.f32.mrf.mxu2 }
 0x13f   :  { %v357_v45 = vadd.f32 %v650_v43, %v356_v44 }
 0x140   :  { %v276_v46 = vpop.f32.mrf.mxu1 }
 0x141   :  { %v360_v47 = vmax.f32 %v357_v45, 0.0 }
 0x143   :  { %v361_v48 = vpack.c.bf16 %v360_v47, %v360_v47 }
 0x145   :  { %438 = vmatmul.bf16.vlgmr.msra.gmra.mxu3 %v361_v48 }
 0x146   :  { %v358_v49 = vpop.f32.mrf.mxu2 }
 0x1c8   :  { %v439_v51 = vpop.f32.mrf.mxu3 }
 0x1c9   :  { %v440_v52 = vadd.f32 %v651_v50, %v439_v51 }
 0x1cb   :  { %443 = vst [vmem:[#allocation12] sm:$0xff] %v440_v52 }
 0x1cc   :  { %465 = dma.vmem_to_hbm [thread:$0]  %s461_s26, 128, %s463_s28, [#allocation13]  }
 0x1d0   :  { %v441_v53 = vpop.f32.mrf.mxu3 }
 0x1d1   :  { %826 = dma.done.wait [#allocation4], 128  }
 0x1d2   :  { %827 = vsyncadd [#allocation4], 4294967168 }
 0x1d3   :  { %828 = dma.done.wait [#allocation13], 128  }
 0x1d4   :  { %829 = vsyncadd [#allocation13], 4294967168 }
 0x1d5   :  { %474 = vsyncpa [#allocation3], 1 }
 0x1d6   :  { %475 = vsyncpa [#allocation6], 1 }
 0x1d7   :  { %476 = vsyncpa [#allocation9], 1 }
 0x1d8   :  { %477 = vsyncpa [#allocation4], 1 }
 0x1d9   :  { %478 = vsyncpa [#allocation13], 1 }

</bundles_post_ra>
